<compile_context>
chip_gen: v7x
topology: tpu7x:2x2x1
jax: 0.10.0
libtpu: 0.0.40
codegen_flags: <defaults>
</compile_context>

<pallas_src>
import functools

import jax
import jax.numpy as jnp
from jax.experimental import pallas as pl
from jax.experimental.pallas import tpu as pltpu

N_AGENTS = 3          # args.n_agents
STATE_DIM = 16        # prod(args.state_shape)
EMBED = 32            # args.mixing_embed_dim
HYPER_EMBED = 64      # args.hypernet_embed  (hypernet_layers == 2)
TILE_B = 512          # batch-tile size for large batches (multiple of 8)


def _round_up(x, m):
    return ((x + m - 1) // m) * m


# --------------------------------------------------------------------------- #
# Fused kernel: hypernetworks + mixing for one batch tile of TB samples.
# --------------------------------------------------------------------------- #
def _qmix_kernel(x_ref, s_ref,
                 wcat_ref, bcat_ref,          # fused first-layer heads (S, 2H+2E)
                 w1_l2_w, w1_l2_b,            # hyper_w_1 second layer (H, NA*E)
                 wf_l2_w, wf_l2_b,            # hyper_w_final second layer (H, E)
                 v_l2_wT, v_l2_b,             # V second layer, transposed row (1, E)
                 out_ref):
    H, E, NA = HYPER_EMBED, EMBED, N_AGENTS

    s = s_ref[...]                                                     # (TB, S)
    x = x_ref[...]                                                     # (TB, NA)

    # One matmul for all state-input heads:
    # columns = [hyper_w_1.L1 (H) | hyper_w_final.L1 (H) | V.L1 (E) | hyper_b_1 (E)]
    z = jnp.dot(s, wcat_ref[...], preferred_element_type=jnp.float32) + bcat_ref[...]
    h_w1 = jnp.maximum(z[:, :H], 0.0)                                  # ReLU branch
    h_wf = jnp.maximum(z[:, H:2 * H], 0.0)
    h_v = jnp.maximum(z[:, 2 * H:2 * H + E], 0.0)
    b1 = z[:, 2 * H + E:2 * H + 2 * E]                                 # no ReLU

    # Second hypernet layers.
    w1 = jnp.abs(jnp.dot(h_w1, w1_l2_w[...],
                         preferred_element_type=jnp.float32) + w1_l2_b[...])   # (TB, NA*E)
    wf = jnp.abs(jnp.dot(h_wf, wf_l2_w[...],
                         preferred_element_type=jnp.float32) + wf_l2_b[...])   # (TB, E)
    v = jnp.sum(h_v * v_l2_wT[...], axis=1, keepdims=True) + v_l2_b[...]       # (TB, 1)

    # hidden = elu(bmm(agent_qs, w1) + b1): per-sample contraction over agents,
    # unrolled over the (small) agent dim -> pure VPU multiply-adds.
    acc = b1
    for a in range(NA):
        acc = acc + x[:, a:a + 1] * w1[:, a * E:(a + 1) * E]
    hidden = jnp.where(acc > 0, acc, jnp.exp(jnp.minimum(acc, 0.0)) - 1.0)      # elu

    # y = bmm(hidden, w_final) + v  -> (TB, 1)
    out_ref[...] = jnp.sum(hidden * wf, axis=1, keepdims=True) + v


# --------------------------------------------------------------------------- #
# Wrapper
# --------------------------------------------------------------------------- #
@jax.jit
def qmixer_forward(agent_qs, states, params):
    bs, T, na = agent_qs.shape
    assert na == N_AGENTS
    B = bs * T
    S, H, E, NA = STATE_DIM, HYPER_EMBED, EMBED, N_AGENTS

    x = agent_qs.reshape(B, NA).astype(jnp.float32)
    s = states.reshape(B, S).astype(jnp.float32)

    # Pad the flattened batch to a multiple of the tile size.
    TB = min(TILE_B, _round_up(B, 8))
    B_pad = _round_up(B, TB)
    if B_pad != B:
        x = jnp.pad(x, ((0, B_pad - B), (0, 0)))
        s = jnp.pad(s, ((0, B_pad - B), (0, 0)))
    nb = B_pad // TB

    # Fuse the four state->* first-layer heads into one weight matrix.
    wcat = jnp.concatenate([params['hw1_l1_w'], params['hwf_l1_w'],
                            params['v_l1_w'], params['hb1_w']], axis=1)    # (S, 2H+2E)
    bcat = jnp.concatenate([params['hw1_l1_b'], params['hwf_l1_b'],
                            params['v_l1_b'], params['hb1_b']], axis=1)    # (1, 2H+2E)
    v_l2_wT = params['v_l2_w'].reshape(1, E)                               # (1, E)

    weights = (wcat, bcat,
               params['hw1_l2_w'], params['hw1_l2_b'],
               params['hwf_l2_w'], params['hwf_l2_b'],
               v_l2_wT, params['v_l2_b'])

    def full_spec(arr):
        return pl.BlockSpec(arr.shape, lambda i: (0, 0))

    in_specs = ([pl.BlockSpec((TB, NA), lambda i: (i, 0)),
                 pl.BlockSpec((TB, S), lambda i: (i, 0))]
                + [full_spec(w) for w in weights])

    out = pl.pallas_call(
        _qmix_kernel,
        out_shape=jax.ShapeDtypeStruct((B_pad, 1), jnp.float32),
        grid=(nb,),
        in_specs=in_specs,
        out_specs=pl.BlockSpec((TB, 1), lambda i: (i, 0)),
        compiler_params=pltpu.CompilerParams(
            dimension_semantics=("parallel",)),
    )(x, s, *weights)

    # q_tot = y.view(bs, -1, 1)
    return out[:B].reshape(bs, T, 1)


# --------------------------------------------------------------------------- #
# Pure-JAX reference (mirrors QMixer_bak.forward with hypernet_layers=2, abs=True)
# --------------------------------------------------------------------------- #
def reference_forward(agent_qs, states, p):
    bs, T, na = agent_qs.shape
    B = bs * T
    s = states.reshape(B, STATE_DIM).astype(jnp.float32)
    x = agent_qs.reshape(B, 1, na).astype(jnp.float32)

    h1 = jax.nn.relu(s @ p['hw1_l1_w'] + p['hw1_l1_b'])
    w1 = jnp.abs(h1 @ p['hw1_l2_w'] + p['hw1_l2_b']).reshape(B, na, EMBED)
    b1 = (s @ p['hb1_w'] + p['hb1_b']).reshape(B, 1, EMBED)
    hidden = jax.nn.elu(jnp.einsum('bia,bae->bie', x, w1) + b1)

    hf = jax.nn.relu(s @ p['hwf_l1_w'] + p['hwf_l1_b'])
    wf = jnp.abs(hf @ p['hwf_l2_w'] + p['hwf_l2_b']).reshape(B, EMBED, 1)

    hv = jax.nn.relu(s @ p['v_l1_w'] + p['v_l1_b'])
    v = (hv @ p['v_l2_w'] + p['v_l2_b']).reshape(B, 1, 1)

    y = jnp.einsum('bie,bej->bij', hidden, wf) + v
    return y.reshape(bs, -1, 1)


def init_params(key):
    S, H, E, NA = STATE_DIM, HYPER_EMBED, EMBED, N_AGENTS
    keys = iter(jax.random.split(key, 16))

    def nrm(shape, scale=0.1):
        return scale * jax.random.normal(next(keys), shape, jnp.float32)

    p = {}
    # hyper_w_1: Linear(S,H) -> ReLU -> Linear(H, E*NA)
    p['hw1_l1_w'], p['hw1_l1_b'] = nrm((S, H)), nrm((1, H))
    p['hw1_l2_w'], p['hw1_l2_b'] = nrm((H, NA * E)), nrm((1, NA * E))
    # hyper_w_final: Linear(S,H) -> ReLU -> Linear(H, E)
    p['hwf_l1_w'], p['hwf_l1_b'] = nrm((S, H)), nrm((1, H))
    p['hwf_l2_w'], p['hwf_l2_b'] = nrm((H, E)), nrm((1, E))
    # hyper_b_1: Linear(S, E)
    p['hb1_w'], p['hb1_b'] = nrm((S, E)), nrm((1, E))
    # V: Linear(S,E) -> ReLU -> Linear(E, 1)
    p['v_l1_w'], p['v_l1_b'] = nrm((S, E)), nrm((1, E))
    p['v_l2_w'], p['v_l2_b'] = nrm((E, 1)), nrm((1, 1))
    return p


if __name__ == "__main__":
    key = jax.random.PRNGKey(0)
    kq, ks, kp = jax.random.split(key, 3)
    bs, T = 2, 8                       # B = bs*T = 16 flattened samples
    agent_qs = jax.random.normal(kq, (bs, T, N_AGENTS), jnp.float32)
    states = jax.random.normal(ks, (bs, T, STATE_DIM), jnp.float32)
    params = init_params(kp)

    q_tot = qmixer_forward(agent_qs, states, params)
    q_tot = jax.block_until_ready(q_tot)

    ref = reference_forward(agent_qs, states, params)
    assert q_tot.shape == (bs, T, 1), q_tot.shape
    assert bool(jnp.all(jnp.isfinite(q_tot)))
    assert bool(jnp.allclose(q_tot, ref, atol=1e-4, rtol=1e-4)), \
        float(jnp.max(jnp.abs(q_tot - ref)))
    print("KERNEL_OK")
</pallas_src>

<mosaic_0001>
module attributes {stable_mosaic.version = 11 : i64} {
  func.func @_qmix_kernel(%arg0: i32, %arg1: memref<16x3xf32, #tpu.memory_space<vmem>>, %arg2: memref<16x16xf32, #tpu.memory_space<vmem>>, %arg3: memref<16x192xf32, #tpu.memory_space<vmem>>, %arg4: memref<1x192xf32, #tpu.memory_space<vmem>>, %arg5: memref<64x96xf32, #tpu.memory_space<vmem>>, %arg6: memref<1x96xf32, #tpu.memory_space<vmem>>, %arg7: memref<64x32xf32, #tpu.memory_space<vmem>>, %arg8: memref<1x32xf32, #tpu.memory_space<vmem>>, %arg9: memref<1x32xf32, #tpu.memory_space<vmem>>, %arg10: memref<1x1xf32, #tpu.memory_space<vmem>>, %arg11: memref<16x1xf32, #tpu.memory_space<vmem>>) attributes {dimension_semantics = [#tpu.dimension_semantics<parallel>], iteration_bounds = array<i64: 1>, scalar_prefetch = 0 : i64, scratch_operands = 0 : i64, tpu.core_type = #tpu.core_type<tc>, window_params = [{transform_indices = @transform_0, window_bounds = array<i64: 16, 3>}, {transform_indices = @transform_1, window_bounds = array<i64: 16, 16>}, {pipeline_mode = #tpu.pipeline_mode<synchronous>, transform_indices = @transform_2, window_bounds = array<i64: 16, 192>}, {pipeline_mode = #tpu.pipeline_mode<synchronous>, transform_indices = @transform_3, window_bounds = array<i64: 1, 192>}, {pipeline_mode = #tpu.pipeline_mode<synchronous>, transform_indices = @transform_4, window_bounds = array<i64: 64, 96>}, {pipeline_mode = #tpu.pipeline_mode<synchronous>, transform_indices = @transform_5, window_bounds = array<i64: 1, 96>}, {pipeline_mode = #tpu.pipeline_mode<synchronous>, transform_indices = @transform_6, window_bounds = array<i64: 64, 32>}, {pipeline_mode = #tpu.pipeline_mode<synchronous>, transform_indices = @transform_7, window_bounds = array<i64: 1, 32>}, {pipeline_mode = #tpu.pipeline_mode<synchronous>, transform_indices = @transform_8, window_bounds = array<i64: 1, 32>}, {pipeline_mode = #tpu.pipeline_mode<synchronous>, transform_indices = @transform_9, window_bounds = array<i64: 1, 1>}, {transform_indices = @transform_10, window_bounds = array<i64: 16, 1>}]} {
    %c0 = arith.constant 0 : index
    %c0_0 = arith.constant 0 : index
    %0 = vector.load %arg2[%c0, %c0_0] : memref<16x16xf32, #tpu.memory_space<vmem>>, vector<16x16xf32>
    %c0_1 = arith.constant 0 : index
    %c0_2 = arith.constant 0 : index
    %1 = vector.load %arg1[%c0_1, %c0_2] : memref<16x3xf32, #tpu.memory_space<vmem>>, vector<16x3xf32>
    %c0_3 = arith.constant 0 : index
    %c0_4 = arith.constant 0 : index
    %2 = vector.load %arg3[%c0_3, %c0_4] : memref<16x192xf32, #tpu.memory_space<vmem>>, vector<16x192xf32>
    %cst = arith.constant dense<0.000000e+00> : vector<16x192xf32>
    %3 = tpu.matmul %0, %2, %cst {dimension_numbers = #tpu.dot_dimension_numbers<[1], [0], [0], [1], [0, 0, 1, 1], [], []>} : vector<16x16xf32>, vector<16x192xf32>, vector<16x192xf32> -> vector<16x192xf32>
    %c0_5 = arith.constant 0 : index
    %c0_6 = arith.constant 0 : index
    %4 = vector.load %arg4[%c0_5, %c0_6] : memref<1x192xf32, #tpu.memory_space<vmem>>, vector<1x192xf32>
    %5 = vector.broadcast %4 : vector<1x192xf32> to vector<16x192xf32>
    %6 = arith.addf %3, %5 : vector<16x192xf32>
    %7 = vector.extract_strided_slice %6 {offsets = [0, 0], sizes = [16, 64], strides = [1, 1]} : vector<16x192xf32> to vector<16x64xf32>
    %cst_7 = arith.constant 0.000000e+00 : f32
    %8 = vector.broadcast %cst_7 : f32 to vector<16x64xf32>
    %9 = arith.maximumf %7, %8 : vector<16x64xf32>
    %10 = vector.extract_strided_slice %6 {offsets = [0, 64], sizes = [16, 64], strides = [1, 1]} : vector<16x192xf32> to vector<16x64xf32>
    %cst_8 = arith.constant 0.000000e+00 : f32
    %11 = vector.broadcast %cst_8 : f32 to vector<16x64xf32>
    %12 = arith.maximumf %10, %11 : vector<16x64xf32>
    %13 = vector.extract_strided_slice %6 {offsets = [0, 128], sizes = [16, 32], strides = [1, 1]} : vector<16x192xf32> to vector<16x32xf32>
    %cst_9 = arith.constant 0.000000e+00 : f32
    %14 = vector.broadcast %cst_9 : f32 to vector<16x32xf32>
    %15 = arith.maximumf %13, %14 : vector<16x32xf32>
    %16 = vector.extract_strided_slice %6 {offsets = [0, 160], sizes = [16, 32], strides = [1, 1]} : vector<16x192xf32> to vector<16x32xf32>
    %c0_10 = arith.constant 0 : index
    %c0_11 = arith.constant 0 : index
    %17 = vector.load %arg5[%c0_10, %c0_11] : memref<64x96xf32, #tpu.memory_space<vmem>>, vector<64x96xf32>
    %cst_12 = arith.constant dense<0.000000e+00> : vector<16x96xf32>
    %18 = tpu.matmul %9, %17, %cst_12 {dimension_numbers = #tpu.dot_dimension_numbers<[1], [0], [0], [1], [0, 0, 1, 1], [], []>} : vector<16x64xf32>, vector<64x96xf32>, vector<16x96xf32> -> vector<16x96xf32>
    %c0_13 = arith.constant 0 : index
    %c0_14 = arith.constant 0 : index
    %19 = vector.load %arg6[%c0_13, %c0_14] : memref<1x96xf32, #tpu.memory_space<vmem>>, vector<1x96xf32>
    %20 = vector.broadcast %19 : vector<1x96xf32> to vector<16x96xf32>
    %21 = arith.addf %18, %20 : vector<16x96xf32>
    %22 = math.absf %21 : vector<16x96xf32>
    %c0_15 = arith.constant 0 : index
    %c0_16 = arith.constant 0 : index
    %23 = vector.load %arg7[%c0_15, %c0_16] : memref<64x32xf32, #tpu.memory_space<vmem>>, vector<64x32xf32>
    %cst_17 = arith.constant dense<0.000000e+00> : vector<16x32xf32>
    %24 = tpu.matmul %12, %23, %cst_17 {dimension_numbers = #tpu.dot_dimension_numbers<[1], [0], [0], [1], [0, 0, 1, 1], [], []>} : vector<16x64xf32>, vector<64x32xf32>, vector<16x32xf32> -> vector<16x32xf32>
    %c0_18 = arith.constant 0 : index
    %c0_19 = arith.constant 0 : index
    %25 = vector.load %arg8[%c0_18, %c0_19] : memref<1x32xf32, #tpu.memory_space<vmem>>, vector<1x32xf32>
    %26 = vector.broadcast %25 : vector<1x32xf32> to vector<16x32xf32>
    %27 = arith.addf %24, %26 : vector<16x32xf32>
    %28 = math.absf %27 : vector<16x32xf32>
    %c0_20 = arith.constant 0 : index
    %c0_21 = arith.constant 0 : index
    %29 = vector.load %arg9[%c0_20, %c0_21] : memref<1x32xf32, #tpu.memory_space<vmem>>, vector<1x32xf32>
    %30 = vector.broadcast %29 : vector<1x32xf32> to vector<16x32xf32>
    %31 = arith.mulf %15, %30 : vector<16x32xf32>
    %cst_22 = arith.constant dense<0.000000e+00> : vector<16xf32>
    %32 = vector.multi_reduction <add>, %31, %cst_22 [1] : vector<16x32xf32> to vector<16xf32>
    %33 = vector.shape_cast %32 : vector<16xf32> to vector<16x1xf32>
    %c0_23 = arith.constant 0 : index
    %c0_24 = arith.constant 0 : index
    %34 = vector.load %arg10[%c0_23, %c0_24] : memref<1x1xf32, #tpu.memory_space<vmem>>, vector<1x1xf32>
    %35 = vector.broadcast %34 : vector<1x1xf32> to vector<16x1xf32>
    %36 = arith.addf %33, %35 : vector<16x1xf32>
    %37 = vector.extract_strided_slice %1 {offsets = [0, 0], sizes = [16, 1], strides = [1, 1]} : vector<16x3xf32> to vector<16x1xf32>
    %38 = vector.extract_strided_slice %22 {offsets = [0, 0], sizes = [16, 32], strides = [1, 1]} : vector<16x96xf32> to vector<16x32xf32>
    %39 = vector.broadcast %37 : vector<16x1xf32> to vector<16x32xf32>
    %40 = arith.mulf %39, %38 : vector<16x32xf32>
    %41 = arith.addf %16, %40 : vector<16x32xf32>
    %42 = vector.extract_strided_slice %1 {offsets = [0, 1], sizes = [16, 1], strides = [1, 1]} : vector<16x3xf32> to vector<16x1xf32>
    %43 = vector.extract_strided_slice %22 {offsets = [0, 32], sizes = [16, 32], strides = [1, 1]} : vector<16x96xf32> to vector<16x32xf32>
    %44 = vector.broadcast %42 : vector<16x1xf32> to vector<16x32xf32>
    %45 = arith.mulf %44, %43 : vector<16x32xf32>
    %46 = arith.addf %41, %45 : vector<16x32xf32>
    %47 = vector.extract_strided_slice %1 {offsets = [0, 2], sizes = [16, 1], strides = [1, 1]} : vector<16x3xf32> to vector<16x1xf32>
    %48 = vector.extract_strided_slice %22 {offsets = [0, 64], sizes = [16, 32], strides = [1, 1]} : vector<16x96xf32> to vector<16x32xf32>
    %49 = vector.broadcast %47 : vector<16x1xf32> to vector<16x32xf32>
    %50 = arith.mulf %49, %48 : vector<16x32xf32>
    %51 = arith.addf %46, %50 : vector<16x32xf32>
    %cst_25 = arith.constant 0.000000e+00 : f32
    %52 = vector.broadcast %cst_25 : f32 to vector<16x32xf32>
    %53 = arith.cmpf ogt, %51, %52 : vector<16x32xf32>
    %cst_26 = arith.constant 0.000000e+00 : f32
    %54 = vector.broadcast %cst_26 : f32 to vector<16x32xf32>
    %55 = arith.minimumf %51, %54 : vector<16x32xf32>
    %56 = math.exp %55 : vector<16x32xf32>
    %cst_27 = arith.constant 1.000000e+00 : f32
    %57 = vector.broadcast %cst_27 : f32 to vector<16x32xf32>
    %58 = arith.subf %56, %57 : vector<16x32xf32>
    %59 = arith.select %53, %51, %58 : vector<16x32xi1>, vector<16x32xf32>
    %60 = arith.mulf %59, %28 : vector<16x32xf32>
    %cst_28 = arith.constant dense<0.000000e+00> : vector<16xf32>
    %61 = vector.multi_reduction <add>, %60, %cst_28 [1] : vector<16x32xf32> to vector<16xf32>
    %62 = vector.shape_cast %61 : vector<16xf32> to vector<16x1xf32>
    %63 = arith.addf %62, %36 : vector<16x1xf32>
    %c0_29 = arith.constant 0 : index
    %c0_30 = arith.constant 0 : index
    %64 = vector.load %arg11[%c0_29, %c0_30] : memref<16x1xf32, #tpu.memory_space<vmem>>, vector<16x1xf32>
    tpu.vector_store %arg11[%c0_29, %c0_30], %63 {strides = array<i32>} : memref<16x1xf32, #tpu.memory_space<vmem>>, vector<16x1xf32>,
    return
  }
  func.func @transform_0(%arg0: i32) -> (i32, i32) {
    %c0_i32 = arith.constant 0 : i32
    %c0_i32_0 = arith.constant 0 : i32
    return %arg0, %c0_i32 : i32, i32
  }
  func.func @transform_1(%arg0: i32) -> (i32, i32) {
    %c0_i32 = arith.constant 0 : i32
    %c0_i32_0 = arith.constant 0 : i32
    return %arg0, %c0_i32 : i32, i32
  }
  func.func @transform_2(%arg0: i32) -> (i32, i32) {
    %c0_i32 = arith.constant 0 : i32
    %c0_i32_0 = arith.constant 0 : i32
    %c0_i32_1 = arith.constant 0 : i32
    return %c0_i32, %c0_i32_0 : i32, i32
  }
  func.func @transform_3(%arg0: i32) -> (i32, i32) {
    %c0_i32 = arith.constant 0 : i32
    %c0_i32_0 = arith.constant 0 : i32
    %c0_i32_1 = arith.constant 0 : i32
    return %c0_i32, %c0_i32_0 : i32, i32
  }
  func.func @transform_4(%arg0: i32) -> (i32, i32) {
    %c0_i32 = arith.constant 0 : i32
    %c0_i32_0 = arith.constant 0 : i32
    %c0_i32_1 = arith.constant 0 : i32
    return %c0_i32, %c0_i32_0 : i32, i32
  }
  func.func @transform_5(%arg0: i32) -> (i32, i32) {
    %c0_i32 = arith.constant 0 : i32
    %c0_i32_0 = arith.constant 0 : i32
    %c0_i32_1 = arith.constant 0 : i32
    return %c0_i32, %c0_i32_0 : i32, i32
  }
  func.func @transform_6(%arg0: i32) -> (i32, i32) {
    %c0_i32 = arith.constant 0 : i32
    %c0_i32_0 = arith.constant 0 : i32
    %c0_i32_1 = arith.constant 0 : i32
    return %c0_i32, %c0_i32_0 : i32, i32
  }
  func.func @transform_7(%arg0: i32) -> (i32, i32) {
    %c0_i32 = arith.constant 0 : i32
    %c0_i32_0 = arith.constant 0 : i32
    %c0_i32_1 = arith.constant 0 : i32
    return %c0_i32, %c0_i32_0 : i32, i32
  }
  func.func @transform_8(%arg0: i32) -> (i32, i32) {
    %c0_i32 = arith.constant 0 : i32
    %c0_i32_0 = arith.constant 0 : i32
    %c0_i32_1 = arith.constant 0 : i32
    return %c0_i32, %c0_i32_0 : i32, i32
  }
  func.func @transform_9(%arg0: i32) -> (i32, i32) {
    %c0_i32 = arith.constant 0 : i32
    %c0_i32_0 = arith.constant 0 : i32
    %c0_i32_1 = arith.constant 0 : i32
    return %c0_i32, %c0_i32_0 : i32, i32
  }
  func.func @transform_10(%arg0: i32) -> (i32, i32) {
    %c0_i32 = arith.constant 0 : i32
    %c0_i32_0 = arith.constant 0 : i32
    return %arg0, %c0_i32 : i32, i32
  }
}

</mosaic_0001>

<bundles_post_ra>
// kernel: qmixer_forward.1
= control target key start
LH: loop header
LB: loop body
LE: loop exit
PB: predicated region body
PF: predicated region fallthrough
CT: control target
= control target key end

     0   :  { %v591_v3 = vmov 0.0   ;;  %vm57_vm0 = vcmask 130048   ;;  %v592_v21 = vmov 0   ;;  %v593_v23 = vmov 2   ;;  %s595_s18 = smov 64   ;;  %s596_s19 = smov 32   ;;  %s758_s2 = inlined_call_operand.vmem [shape: f32[16,192], index: 2, kind: input, shape index: {}]   ;;  %s759_s4 = inlined_call_operand.vmem [shape: f32[64,96], index: 4, kind: input, shape index: {}]   ;;  %s760_s1 = inlined_call_operand.vmem [shape: f32[16,16], index: 1, kind: input, shape index: {}]   ;;  %s761_s0 = inlined_call_operand.vmem [shape: f32[16,3], index: 0, kind: input, shape index: {}]   ;;  %s762_s6 = inlined_call_operand.vmem [shape: f32[64,32], index: 6, kind: input, shape index: {}]   ;;  %s763_s3 = inlined_call_operand.vmem [shape: f32[1,192], index: 3, kind: input, shape index: {}]   ;;  %s764_s5 = inlined_call_operand.vmem [shape: f32[1,96], index: 5, kind: input, shape index: {}]   ;;  %s765_s7 = inlined_call_operand.vmem [shape: f32[1,32], index: 7, kind: input, shape index: {}]   ;;  %s766_s9 = inlined_call_operand.<no memory space> [shape: f32[1,1], index: 9, kind: input, shape index: {}]   ;;  %s767_s8 = inlined_call_operand.vmem [shape: f32[1,32], index: 8, kind: input, shape index: {}]   ;;  %s768_s10 = inlined_call_operand.vmem [shape: f32[16,1], index: 10, kind: output, shape index: {}]  }
   0x1   :  { %v42_v0 = vld [vmem:[%s758_s2 + $0x8] sm:$0xff]  ;;  %v44_v1 = vld [vmem:[%s758_s2 + $0x18] sm:$0xff]  ;;  %v41_v2 = vld [vmem:[%s758_s2] sm:$0xff]  ;;  %128 = vmatprep.mubr.f32.mxu0 %v591_v3  ;;  %581 = vset.pattern.permute.xlu1 %v592_v21  ;;  %v594_v33 = vmov 1   ;;  %v47_v35 = vlaneseq  ;;  %vm160_vm1 = vcmask 523264   ;;  %vm353_vm4 = vcmask 261120  }
   0x2   :  { %v538_v4 = vpack.c.bf16 %v44_v1, %v42_v0  ;;  %v43_v5 = vld [vmem:[%s758_s2 + $0x10] sm:$0xff]  ;;  %v145_v7 = vld [vmem:[%s759_s4] sm:$0xff]  ;;  %v146_v8 = vld [vmem:[%s759_s4 + $0x8] sm:$0xff]  ;;  %582 = vset.pattern.permute.xlu0 %v593_v23  ;;  %vm461_vm5 = vcmask 7168  }
   0x3   :  { %v540_v6 = vpack.c.bf16 %v43_v5, %v41_v2  ;;  %v147_v9 = vld [vmem:[%s759_s4 + $0x10] sm:$0xff]  ;;  %v542_v10 = vpack.c.bf16 %v146_v8, %v145_v7  ;;  %v148_v11 = vld [vmem:[%s759_s4 + $0x18] sm:$0xff]  ;;  %v37_v12 = vld [vmem:[%s760_s1] sm:$0xff]  ;;  %v719_v36 = vshrl.u32 %v47_v35, 7 }
   0x4   :  { %539 = vmatprep.subr.bf16.mxu0 %v538_v4  ;;  %v546_v13 = vpack.c.bf16 %v148_v11, %v147_v9  ;;  %v38_v14 = vld [vmem:[%s760_s1 + $0x8] sm:$0xff]  ;;  %v149_v15 = vld [vmem:[%s759_s4 + $0x20] sm:$0xff]  ;;  %v151_v18 = vld [vmem:[%s759_s4 + $0x30] sm:$0xff]  ;;  %s597_s1 = smov 96  }
   0x5   :  { %541 = vmatpush1.bf16.msra.mxu0 %v540_v6  ;;  %543 = vmatprep.subr.bf16.mxu1 %v542_v10  ;;  %v150_v16 = vld [vmem:[%s759_s4 + $0x28] sm:$0xff]  ;;  %v152_v19 = vld [vmem:[%s759_s4 + $0x38] sm:$0xff]  ;;  %v39_v22 = vld [vmem:[%s761_s0] sm:$0xff]  ;;  %v49_v40 = vsub.s32 0, %v719_v36  ;;  %v53_v5 = vsub.s32 1, %v719_v36 }
   0x6   :  { %545 = vmatpush3.bf16.msra.mxu1 %v542_v10  ;;  %v550_v17 = vpack.c.bf16 %v150_v16, %v149_v15  ;;  %v554_v20 = vpack.c.bf16 %v152_v19, %v151_v18  ;;  %371 = vperm.xlu1 %581, %v39_v22   ;;  %v40_v24 = vld [vmem:[%s761_s0 + $0x8] sm:$0xff]  ;;  %v244_v25 = vld [vmem:[%s762_s6] sm:$0xff]  ;;  %v246_v27 = vld [vmem:[%s762_s6 + $0x10] sm:$0xff] }
   0x7   :  { %547 = vmatprep.subr.bf16.mxu1 %v546_v13  ;;  %v245_v26 = vld [vmem:[%s762_s6 + $0x8] sm:$0xff]  ;;  %v247_v29 = vld [vmem:[%s762_s6 + $0x18] sm:$0xff]  ;;  %v248_v31 = vld [vmem:[%s762_s6 + $0x20] sm:$0xff] }
   0x8   :  { %468 = vmatmul.mubr.msk.f32.vlgmr.msra.gmra.mrb[0].mxu0 %vm57_vm0, %v37_v12  ;;  %v558_v28 = vpack.c.bf16 %v245_v26, %v244_v25  ;;  %v562_v30 = vpack.c.bf16 %v247_v29, %v246_v27  ;;  %v249_v32 = vld [vmem:[%s762_s6 + $0x28] sm:$0xff]  ;;  %v250_v37 = vld [vmem:[%s762_s6 + $0x30] sm:$0xff]  ;;  %v251_v38 = vld [vmem:[%s762_s6 + $0x38] sm:$0xff] }
   0x9   :  { %134 = vmatprep.mubr.f32.mxu0 %v591_v3  ;;  %v566_v34 = vpack.c.bf16 %v249_v32, %v248_v31  ;;  %v570_v39 = vpack.c.bf16 %v251_v38, %v250_v37  ;;  %v45_v41 = vld [vmem:[%s763_s3] sm:$0x3]  ;;  %v15_v37 = vstv %s766_s9 }
   0xa   :  { %549 = vmatpush3.bf16.msra.mxu1 %v546_v13  ;;  %376 = vperm.xlu1 %581, %v40_v24   ;;  %v50_v42 = vrot.slane %v45_v41, %v49_v40  ;;  %v470_v54 = vld [vmem:[%s764_s5] ss:$0 sm:$0xff]  ;;  %v54_v11 = vrot.slane %v45_v41, %v53_v5  ;;  %16 = vst [vmem:[#allocation2] sm:$0x1] %v15_v37 }
   0xb   :  { %551 = vmatprep.subr.bf16.mxu1 %v550_v17  ;;  %559 = vmatprep.subr.bf16.mxu0 %v558_v28  ;;  %v473_v4 = vld [vmem:[%s765_s7] ss:$0 sm:$0xff] }
   0xc   :  { %469 = vmatmul.mubr.msk.f32.gmra.mrb[2].mxu0 %vm57_vm0, %v38_v14 }
   0xd   :  { %561 = vmatpush3.bf16.msra.mxu0 %v558_v28 }
   0xe   :  { %553 = vmatpush3.bf16.msra.mxu1 %v550_v17  ;;  %583 = vset.pattern.permute.xlu1 %v593_v23 }
   0xf   :  { %555 = vmatprep.subr.bf16.mxu1 %v554_v20  ;;  %408 = vperm.xlu1 %583, %v40_v24  }
  0x10   :  { %563 = vmatprep.subr.bf16.mxu0 %v562_v30 }
  0x11   :  { %565 = vmatpush3.bf16.msra.mxu0 %v562_v30 }
  0x12   :  { %557 = vmatpush3.bf16.msra.mxu1 %v554_v20  ;;  %567 = vmatprep.subr.bf16.mxu0 %v566_v34 }
  0x13   :  { %584 = vset.pattern.permute.xlu1 %v594_v33 }
  0x14   :  { %392 = vperm.xlu1 %584, %v39_v22  }
  0x15   :  { %569 = vmatpush3.bf16.msra.mxu0 %v566_v34 }
  0x16   :  { %571 = vmatprep.subr.bf16.mxu0 %v570_v39 }
  0x19   :  { %573 = vmatpush3.bf16.msra.mxu0 %v570_v39 }
  0x85   :  { %v372_v53 = vpop.permute.xlu1 %371 }
  0x89   :  { %v377_v60 = vpop.permute.xlu1 %376 }
  0x8e   :  { %v409_v2 = vpop.permute.xlu1 %408 }
  0x93   :  { %v393_v9 = vpop.permute.xlu1 %392 }
  0xdb   :  { %v130_v43 = vpop.f32.mrb[0].mxu0 }
  0xdc   :  { %v131_v44 = vadd.f32 %v130_v43, %v50_v42  ;;  %v132_v45 = vpop.f32.mrb[1].mxu0 }
  0xdd   :  { %v133_v19 = vadd.f32 %v132_v45, %v54_v11  ;;  %v476_v45 = vld [vmem:[%s767_s8] ss:$0 sm:$0xff] }
  0xde   :  { %v141_v46 = vmax.f32 %v131_v44, 0.0 }
  0xdf   :  { %v136_v47 = vpop.f32.mrb[2].mxu0  ;;  %v143_v44 = vmax.f32 %v133_v19, 0.0 }
  0xe0   :  { %v137_v48 = vadd.f32 %v136_v47, %v50_v42  ;;  %v138_v49 = vpop.f32.mrb[3].mxu0  ;;  %259 = vrot.lane.b32.xlu0 %v141_v46, %s595_s18  ;;  %516 = vmatprep.mubr.msk.f32.mxu1 %vm160_vm1, %v141_v46 }
  0xe1   :  { %v139_v15 = vadd.f32 %v138_v49, %v54_v11  ;;  %v351_v47 = vmul.f32 %v476_v45, %v143_v44 }
  0xe2   :  { %v142_v50 = vmax.f32 %v137_v48, 0.0 }
  0xe3   :  { %v144_v46 = vmax.f32 %v139_v15, 0.0  ;;  %v354_v48 = vsel %vm353_vm4, %v351_v47, 0.0 }
  0xe4   :  { %261 = vrot.lane.b32.xlu0 %v142_v50, %s595_s18  ;;  %517 = vmatmul.mubr.msk.f32.vlgmr.msra.gmra.mrb[0].mxu1 %vm160_vm1, %v142_v50 }
  0xe5   :  { %v352_v49 = vmul.f32 %v476_v45, %v144_v46 }
  0xe7   :  { %v357_v50 = vsel %vm353_vm4, %v352_v49, 0.0 }
  0xe8   :  { %404 = vperm.xlu0 %582, %v39_v22  }
  0xec   :  { %585 = vset.pattern.permute.xlu0 %v594_v33 }
  0xed   :  { %396 = vperm.xlu0 %585, %v40_v24  }
  0xf1   :  { %586 = vset.pattern.permute.xlu0 %v593_v23 }
 0x152   :  { %v260_v51 = vpop.permute.xlu0 %259 }
 0x153   :  { %535 = vmatprep.mubr.msk.f32.mxu0 %vm160_vm1, %v260_v51 }
 0x156   :  { %v262_v52 = vpop.permute.xlu0 %261 }
 0x157   :  { %536 = vmatmul.mubr.msk.f32.vlgmr.msra.gmra.mrb[4].mxu0 %vm160_vm1, %v262_v52 }
 0x167   :  { %v405_v62 = vpop.permute.xlu0 %404 }
 0x16c   :  { %v397_v13 = vpop.permute.xlu0 %396 }
 0x1b7   :  { %v518_v55 = vpop.f32.mrb[0].mxu1 }
 0x1b8   :  { %v239_v56 = vadd.f32 %v518_v55, %v470_v54  ;;  %v233_v57 = vpop.f32.mrb[1].mxu1  ;;  %v477_v55 = vld [vmem:[#allocation2] ss:$0 sm:$0xff] }
 0x1b9   :  { %v234_v58 = vadd.f32 %v470_v54, %v233_v57 }
 0x1ba   :  { %v243_v59 = vand.u32 2147483647, %v239_v56 }
 0x1bb   :  { %v242_v61 = vand.u32 2147483647, %v234_v58 }
 0x1bc   :  { %v380_v63 = vmul.f32 %v377_v60, %v243_v59  ;;  %v412_v3 = vmul.f32 %v409_v2, %v243_v59  ;;  %v400_v17 = vmul.f32 %v397_v13, %v243_v59 }
 0x1bd   :  { %v411_v0 = vmul.f32 %v405_v62, %v242_v61  ;;  %v379_v1 = vmul.f32 %v372_v53, %v242_v61  ;;  %v399_v22 = vmul.f32 %v393_v9, %v242_v61 }
 0x1be   :  { %385 = vrot.lane.b32.xlu1 %v380_v63, %s596_s19 }
 0x1bf   :  { %415 = vrot.lane.b32.xlu0 %v411_v0, %s597_s1 }
 0x1c2   :  { %383 = vrot.lane.b32.xlu1 %v379_v1, %s596_s19 }
 0x1c6   :  { %417 = vrot.lane.b32.xlu1 %v412_v3, %s597_s1 }
 0x22a   :  { %v537_v6 = vpop.f32.mrb[4].mxu0 }
 0x22b   :  { %v339_v7 = vadd.f32 %v537_v6, %v473_v4  ;;  %v333_v8 = vpop.f32.mrb[5].mxu0 }
 0x22c   :  { %v334_v10 = vadd.f32 %v473_v4, %v333_v8 }
 0x22d   :  { %v343_v12 = vand.u32 2147483647, %v339_v7 }
 0x22e   :  { %v342_v14 = vand.u32 2147483647, %v334_v10 }
 0x22f   :  { %439 = vrot.lane.b32.xlu1 %v343_v12, %s596_s19 }
 0x230   :  { %437 = vrot.lane.b32.xlu0 %v342_v14, %s596_s19  ;;  %v386_v16 = vpop.permute.xlu1 %385 }
 0x231   :  { %v390_v18 = vadd.f32 %v386_v16, %v139_v15  ;;  %v416_v26 = vpop.permute.xlu0 %415 }
 0x233   :  { %v402_v20 = vadd.f32 %v400_v17, %v390_v18 }
 0x234   :  { %v384_v21 = vpop.permute.xlu1 %383 }
 0x235   :  { %v389_v23 = vadd.f32 %v384_v21, %v133_v19 }
 0x237   :  { %v401_v24 = vadd.f32 %v399_v22, %v389_v23 }
 0x238   :  { %v418_v25 = vpop.permute.xlu1 %417 }
 0x239   :  { %v422_v27 = vadd.f32 %v418_v25, %v402_v20  ;;  %v421_v28 = vadd.f32 %v416_v26, %v401_v24 }
 0x23b   :  { %v426_v29 = vmin.f32 %v422_v27, 0.0  ;;  %v425_v30 = vmin.f32 %v421_v28, 0.0  ;;  %vm424_vm2 = vcmp.gt.f32.partialorder %v422_v27, 0.0  ;;  %vm423_vm3 = vcmp.gt.f32.partialorder %v421_v28, 0.0 }
 0x23d   :  { %v429_v31 = vmul.f32 1.442695, %v426_v29  ;;  %v427_v32 = vmul.f32 1.442695, %v425_v30 }
 0x23f   :  { %587 = vpow2.f32 %v429_v31 }
 0x240   :  { %589 = vpow2.f32 %v427_v32 }
 0x249   :  { %v588_v33 = vpop.eup %587 }
 0x24a   :  { %v590_v34 = vpop.eup %589  ;;  %v479_v35 = vadd.f32 -1.0, %v588_v33 }
 0x24b   :  { %v478_v36 = vadd.f32 -1.0, %v590_v34 }
 0x24c   :  { %v434_v38 = vsel %vm424_vm2, %v422_v27, %v479_v35 }
 0x24d   :  { %v433_v42 = vsel %vm423_vm3, %v421_v28, %v478_v36 }
 0x2a1   :  { %v440_v39 = vpop.permute.xlu1 %439 }
 0x2a2   :  { %v444_v40 = vmul.f32 %v440_v39, %v434_v38  ;;  %v438_v41 = vpop.permute.xlu0 %437 }
 0x2a3   :  { %v443_v43 = vmul.f32 %v438_v41, %v433_v42 }
 0x2a4   :  { %449 = vrot.lane.b32.xlu1 %v444_v40, %s597_s1 }
 0x2a5   :  { %447 = vrot.lane.b32.xlu0 %v443_v43, %s597_s1 }
 0x2c4   :  { %355 = vadd.xlane.f32.xlu0 %v354_v48 }
 0x2c8   :  { %358 = vadd.xlane.f32.xlu1 %v357_v50 }
 0x316   :  { %v450_v53 = vpop.permute.xlu1 %449 }
 0x317   :  { %v448_v51 = vpop.permute.xlu0 %447  ;;  %v456_v54 = vsel %vm353_vm4, %v450_v53, 0.0 }
 0x318   :  { %v453_v52 = vsel %vm353_vm4, %v448_v51, 0.0 }
 0x319   :  { %454 = vadd.xlane.f32.xlu0 %v453_v52 }
 0x31d   :  { %457 = vadd.xlane.f32.xlu0 %v456_v54 }
 0x351   :  { %v356_v56 = vpop.xlane.xlu0 %355 }
 0x352   :  { %v367_v57 = vadd.f32 %v477_v55, %v356_v56 }
 0x355   :  { %v359_v58 = vpop.xlane.xlu1 %358 }
 0x356   :  { %v368_v61 = vadd.f32 %v477_v55, %v359_v58 }
 0x3a6   :  { %v455_v59 = vpop.xlane.xlu0 %454 }
 0x3a7   :  { %v459_v60 = vadd.f32 %v455_v59, %v367_v57 }
 0x3a9   :  { %462 = vst.msk [vmem:[%s768_s10] sm:$0xff] %vm461_vm5, %v459_v60 }
 0x3aa   :  { %v458_v62 = vpop.xlane.xlu0 %457 }
 0x3ab   :  { %v460_v63 = vadd.f32 %v458_v62, %v368_v61 }
 0x3ad   :  { %463 = vst.msk [vmem:[%s768_s10 + $0x8] sm:$0xff] %vm461_vm5, %v460_v63 }

</bundles_post_ra>
